<compile_context>
chip_gen: v7x
topology: tpu7x:2x2x1
jax: 0.10.0
libtpu: 0.0.40
codegen_flags: <defaults>
</compile_context>

<pallas_src>
import functools

import numpy as np

import jax
import jax.numpy as jnp
from jax.experimental import pallas as pl

LN_EPS = 1e-5  # torch.nn.LayerNorm default


def memory_encoder_kernel(x_ref, p_ref, out_ref, *,
                          batch, feat, hidden, n_read, row_stride):
    # x_ref:   (batch*seq_full, F)   flattened (un-subsampled) history rows
    # p_ref:   (F + 2 + H + batch, W) packed parameters, W = max(H, n_read):
    #            rows [0, F)           : w1            (F, H)
    #            row  F                : b1            (1, H)
    #            row  F+1              : folded fc_mu bias (1, H)
    #            rows [F+2, F+2+H)     : gamma-folded w2  (H, H)
    #            rows [F+2+H, ...+B)   : pooling matrix  (B, n_read)
    # out_ref: (batch, H)

    # Subsampled-row load: with S % rate == 0 the flat strided sequence
    # 0, rate, 2*rate, ... hits exactly rows b*S + j*rate for every batch b.
    if row_stride == 1:
        x = x_ref[...]                                        # (n_read, F)
    else:
        x = x_ref[pl.ds(0, n_read, stride=row_stride), :]     # (n_read, F)

    w1 = p_ref[0:feat, 0:hidden]                              # (F, H)
    b1 = p_ref[feat:feat + 1, 0:hidden]                       # (1, H)
    b2 = p_ref[feat + 1:feat + 2, 0:hidden]                   # (1, H)
    w2 = p_ref[feat + 2:feat + 2 + hidden, 0:hidden]          # (H, H)
    pool = p_ref[feat + 2 + hidden:feat + 2 + hidden + batch, 0:n_read]  # (B, n_read)

    # encoder Linear + ReLU on the selected rows only.
    h = jnp.dot(x, w1, preferred_element_type=jnp.float32) + b1
    h = jnp.maximum(h, 0.0)

    # LayerNorm (two-pass variance for numerical robustness; affine folded
    # into w2/b2 downstream).
    inv_h = 1.0 / hidden
    mean = jnp.sum(h, axis=-1, keepdims=True) * inv_h
    d = h - mean
    var = jnp.sum(d * d, axis=-1, keepdims=True) * inv_h
    norm = d * jax.lax.rsqrt(var + LN_EPS)

    # Compile-time-constant pooling matrix: per-batch mean over the selected
    # sequence positions, as a single small MXU matmul.
    pooled = jnp.dot(pool, norm, preferred_element_type=jnp.float32)     # (B, H)

    # fc_mu (LayerNorm affine + bias already folded in); one store for the
    # whole (B, H) output.
    mu = jnp.dot(pooled, w2, preferred_element_type=jnp.float32) + b2
    out_ref[...] = mu.astype(out_ref.dtype)


def memory_encoder_forward(x, params, *, true_history_frame_len,
                           frame_seq_len_screening_rate,
                           history_second_screening_rate):
    """x: (batch, seq, features) float32 — same layout/contract as the PyTorch module."""
    assert x.ndim == 3
    assert x.shape[1] == true_history_frame_len // frame_seq_len_screening_rate, x.shape

    B, S_full, F = x.shape
    H = params["w1"].shape[1]
    rate = history_second_screening_rate
    n_sel = -(-S_full // rate)  # number of rows kept by x[:, ::rate, :]

    # Strided in-kernel subsample is only valid when the flat stride pattern
    # does not drift across batch boundaries (rate == 1 or S % rate == 0);
    # otherwise read all rows and encode the subsample in the pool matrix.
    strided_ok = (rate == 1) or (S_full % rate == 0)
    if strided_ok:
        n_read = B * n_sel
        row_stride = rate
        pool = np.zeros((B, n_read), np.float32)
        for b in range(B):
            pool[b, b * n_sel:(b + 1) * n_sel] = 1.0 / n_sel
    else:
        n_read = B * S_full
        row_stride = 1
        pool = np.zeros((B, n_read), np.float32)
        for b in range(B):
            pool[b, b * S_full:(b + 1) * S_full:rate] = 1.0 / n_sel

    # One-time parameter transform (exact algebra): fold LayerNorm gamma/beta
    # and the fc_mu bias into the fc_mu weights.
    w2_folded = params["ln_gamma"][:, None] * params["w2"]          # (H, H)
    b2_folded = params["ln_beta"] @ params["w2"] + params["b2"]     # (H,)

    # Pack EVERYTHING static into one operand (single DMA): pad all pieces to a
    # common lane width W and concatenate along sublanes.
    W = max(H, n_read)

    def pad_w(a):
        return jnp.pad(a, ((0, 0), (0, W - a.shape[1]))) if a.shape[1] < W else a

    packed = jnp.concatenate([
        pad_w(params["w1"]),                 # (F, W)
        pad_w(params["b1"][None, :]),        # (1, W)
        pad_w(b2_folded[None, :]),           # (1, W)
        pad_w(w2_folded),                    # (H, W)
        pad_w(jnp.asarray(pool)),            # (B, W)
    ], axis=0)                               # (F + 2 + H + B, W)

    # Flatten (B, S, F) -> (B*S, F): layout-preserving reshape, no HBM copy of
    # a subsampled tensor — subsampling happens inside the kernel.
    x_flat = x.reshape(B * S_full, F)

    kernel = functools.partial(memory_encoder_kernel,
                               batch=B, feat=F, hidden=H,
                               n_read=n_read, row_stride=row_stride)

    # Single invocation, no grid: every operand is tiny and lives whole in VMEM.
    return pl.pallas_call(
        kernel,
        out_shape=jax.ShapeDtypeStruct((B, H), jnp.float32),
    )(x_flat, packed)


def reference_forward(x, params, *, history_second_screening_rate):
    # Straight transcription of the PyTorch module's math (no folding).
    x = x[:, ::history_second_screening_rate, :]
    h = x @ params["w1"] + params["b1"]
    h = jnp.maximum(h, 0.0)
    mean = jnp.mean(h, axis=-1, keepdims=True)
    var = jnp.mean((h - mean) ** 2, axis=-1, keepdims=True)
    hn = (h - mean) * jax.lax.rsqrt(var + LN_EPS)
    hn = hn * params["ln_gamma"] + params["ln_beta"]
    pooled = jnp.mean(hn, axis=1)
    return pooled @ params["w2"] + params["b2"]


def init_params(key, state_space_size, hidden_size):
    k1, k2, k3, k4, k5, k6 = jax.random.split(key, 6)
    # PyTorch Linear weights are (out, in); we store them pre-transposed (in, out).
    w1 = jax.random.normal(k1, (state_space_size, hidden_size), jnp.float32) * 0.1
    b1 = jax.random.normal(k2, (hidden_size,), jnp.float32) * 0.05
    w2 = jax.random.normal(k3, (hidden_size, hidden_size), jnp.float32) * 0.1
    b2 = jax.random.normal(k4, (hidden_size,), jnp.float32) * 0.05
    # Non-trivial LayerNorm affine so the gamma/beta folding path is exercised.
    ln_gamma = 1.0 + 0.1 * jax.random.normal(k5, (hidden_size,), jnp.float32)
    ln_beta = 0.1 * jax.random.normal(k6, (hidden_size,), jnp.float32)
    return dict(w1=w1, b1=b1, w2=w2, b2=b2, ln_gamma=ln_gamma, ln_beta=ln_beta)


if __name__ == "__main__":
    # proc_settings: true_history_frame_len=16, frame_seq_len_screening_rate=2
    # -> input seq len = 8; history_second_screening_rate=2 -> effective seq = 4.
    batch = 2
    state_space_size = 16
    hidden_size = 32
    true_history_frame_len = 16
    frame_seq_len_screening_rate = 2
    history_second_screening_rate = 2
    seq = true_history_frame_len // frame_seq_len_screening_rate  # 8

    key = jax.random.PRNGKey(0)
    kx, kp = jax.random.split(key)
    x = jax.random.normal(kx, (batch, seq, state_space_size), jnp.float32)
    params = init_params(kp, state_space_size, hidden_size)

    out = memory_encoder_forward(
        x, params,
        true_history_frame_len=true_history_frame_len,
        frame_seq_len_screening_rate=frame_seq_len_screening_rate,
        history_second_screening_rate=history_second_screening_rate,
    )
    out = jax.block_until_ready(out)

    ref = reference_forward(
        x, params, history_second_screening_rate=history_second_screening_rate)
    assert out.shape == (batch, hidden_size)
    assert jnp.allclose(out, ref, atol=1e-4, rtol=1e-4), (out, ref)

    print("KERNEL_OK")
</pallas_src>

<mosaic_0001>
module attributes {stable_mosaic.version = 11 : i64} {
  func.func @memory_encoder_kernel(%arg0: memref<16x16xf32, #tpu.memory_space<vmem>>, %arg1: memref<52x32xf32, #tpu.memory_space<vmem>>, %arg2: memref<2x32xf32, #tpu.memory_space<vmem>>) attributes {dimension_semantics = [], scalar_prefetch = 0 : i64, scratch_operands = 0 : i64, tpu.core_type = #tpu.core_type<tc>} {
    %c0 = arith.constant 0 : index
    %c0_0 = arith.constant 0 : index
    %0 = tpu.strided_load %arg0[%c0, %c0_0] {strides = array<i32: 2, 1>} : memref<16x16xf32, #tpu.memory_space<vmem>>, vector<8x16xf32>
    %c0_1 = arith.constant 0 : index
    %c0_2 = arith.constant 0 : index
    %1 = vector.load %arg1[%c0_1, %c0_2] : memref<52x32xf32, #tpu.memory_space<vmem>>, vector<16x32xf32>
    %c16 = arith.constant 16 : index
    %c0_3 = arith.constant 0 : index
    %2 = vector.load %arg1[%c16, %c0_3] : memref<52x32xf32, #tpu.memory_space<vmem>>, vector<1x32xf32>
    %c17 = arith.constant 17 : index
    %c0_4 = arith.constant 0 : index
    %3 = vector.load %arg1[%c17, %c0_4] : memref<52x32xf32, #tpu.memory_space<vmem>>, vector<1x32xf32>
    %c18 = arith.constant 18 : index
    %c0_5 = arith.constant 0 : index
    %4 = vector.load %arg1[%c18, %c0_5] : memref<52x32xf32, #tpu.memory_space<vmem>>, vector<32x32xf32>
    %c50 = arith.constant 50 : index
    %c0_6 = arith.constant 0 : index
    %5 = vector.load %arg1[%c50, %c0_6] : memref<52x32xf32, #tpu.memory_space<vmem>>, vector<2x8xf32>
    %cst = arith.constant dense<0.000000e+00> : vector<8x32xf32>
    %6 = tpu.matmul %0, %1, %cst {dimension_numbers = #tpu.dot_dimension_numbers<[1], [0], [0], [1], [0, 0, 1, 1], [], []>} : vector<8x16xf32>, vector<16x32xf32>, vector<8x32xf32> -> vector<8x32xf32>
    %7 = vector.broadcast %2 : vector<1x32xf32> to vector<8x32xf32>
    %8 = arith.addf %6, %7 : vector<8x32xf32>
    %cst_7 = arith.constant 0.000000e+00 : f32
    %9 = vector.broadcast %cst_7 : f32 to vector<8x32xf32>
    %10 = arith.maximumf %8, %9 : vector<8x32xf32>
    %cst_8 = arith.constant dense<0.000000e+00> : vector<8xf32>
    %11 = vector.multi_reduction <add>, %10, %cst_8 [1] : vector<8x32xf32> to vector<8xf32>
    %12 = vector.shape_cast %11 : vector<8xf32> to vector<8x1xf32>
    %cst_9 = arith.constant 3.125000e-02 : f32
    %13 = vector.broadcast %cst_9 : f32 to vector<8x1xf32>
    %14 = arith.mulf %12, %13 : vector<8x1xf32>
    %15 = vector.broadcast %14 : vector<8x1xf32> to vector<8x32xf32>
    %16 = arith.subf %10, %15 : vector<8x32xf32>
    %17 = arith.mulf %16, %16 : vector<8x32xf32>
    %cst_10 = arith.constant dense<0.000000e+00> : vector<8xf32>
    %18 = vector.multi_reduction <add>, %17, %cst_10 [1] : vector<8x32xf32> to vector<8xf32>
    %19 = vector.shape_cast %18 : vector<8xf32> to vector<8x1xf32>
    %cst_11 = arith.constant 3.125000e-02 : f32
    %20 = vector.broadcast %cst_11 : f32 to vector<8x1xf32>
    %21 = arith.mulf %19, %20 : vector<8x1xf32>
    %cst_12 = arith.constant 9.99999974E-6 : f32
    %22 = vector.broadcast %cst_12 : f32 to vector<8x1xf32>
    %23 = arith.addf %21, %22 : vector<8x1xf32>
    %24 = math.rsqrt %23 : vector<8x1xf32>
    %25 = vector.broadcast %24 : vector<8x1xf32> to vector<8x32xf32>
    %26 = arith.mulf %16, %25 : vector<8x32xf32>
    %cst_13 = arith.constant dense<0.000000e+00> : vector<2x32xf32>
    %27 = tpu.matmul %5, %26, %cst_13 {dimension_numbers = #tpu.dot_dimension_numbers<[1], [0], [0], [1], [0, 0, 1, 1], [], []>} : vector<2x8xf32>, vector<8x32xf32>, vector<2x32xf32> -> vector<2x32xf32>
    %cst_14 = arith.constant dense<0.000000e+00> : vector<2x32xf32>
    %28 = tpu.matmul %27, %4, %cst_14 {dimension_numbers = #tpu.dot_dimension_numbers<[1], [0], [0], [1], [0, 0, 1, 1], [], []>} : vector<2x32xf32>, vector<32x32xf32>, vector<2x32xf32> -> vector<2x32xf32>
    %29 = vector.broadcast %3 : vector<1x32xf32> to vector<2x32xf32>
    %30 = arith.addf %28, %29 : vector<2x32xf32>
    %c0_15 = arith.constant 0 : index
    %c0_16 = arith.constant 0 : index
    %31 = vector.load %arg2[%c0_15, %c0_16] : memref<2x32xf32, #tpu.memory_space<vmem>>, vector<2x32xf32>
    tpu.vector_store %arg2[%c0_15, %c0_16], %30 {strides = array<i32>} : memref<2x32xf32, #tpu.memory_space<vmem>>, vector<2x32xf32>,
    return
  }
}

</mosaic_0001>

<bundles_post_ra>
// kernel: tpu_custom_call.1
= control target key start
LH: loop header
LB: loop body
LE: loop exit
PB: predicated region body
PF: predicated region fallthrough
CT: control target
= control target key end

     0   :  { %v359_v2 = vmov 0.0|0.0   ;;  %vm360_vm0 = vmmov 0   ;;  %v361_v4 = vmov 0.0   ;;  %s423_s0 = inlined_call_operand.vmem [shape: f32[16,16], index: 0, kind: input, shape index: {}]   ;;  %s424_s1 = inlined_call_operand.vmem [shape: f32[52,32], index: 1, kind: input, shape index: {}]   ;;  %s425_s2 = inlined_call_operand.hbm [shape: f32[2,32], index: 2, kind: output, shape index: {}]  }
   0x1   :  { %v13_v0 = vld [vmem:[%s424_s1] sm:$0xff]  ;;  %v14_v1 = vld [vmem:[%s424_s1 + $0x8] sm:$0xff]  ;;  %320 = vmatprep.subr.bf16.mxu0 %v359_v2  ;;  %301 = vmatprep.mubr.msk.f32.mxu0 %vm360_vm0, %v361_v4 }
   0x2   :  { %v321_v3 = vpack.c.bf16 %v14_v1, %v13_v0 }
   0x3   :  { %7 = vsyncpa [#allocation3], 0  ;;  %323 = vmatprep.subr.bf16.mxu1 %v359_v2  ;;  %317 = vmatprep.mubr.msk.f32.mxu1 %vm360_vm0, %v361_v4  ;;  %v12_v5 = vld [vmem:[%s423_s0] ss:$2 sm:$0xff]  ;;  %vm26_vm1 = vcmask 130048   ;;  %vm101_vm2 = vcmask 261120  }
   0x4   :  { %322 = vmatpush3.bf16.msra.mxu0 %v321_v3  ;;  %v282_v6 = vld [vmem:[%s424_s1 + $0x10] ss:$0 sm:$0xff]  ;;  %v17_v17 = vld [vmem:[%s424_s1 + $0x12] sm:$0xff]  ;;  %v18_v18 = vld [vmem:[%s424_s1 + $0x1a] sm:$0xff]  ;;  %vm115_vm3 = vcmask 64512   ;;  %s362_s28 = smov [#allocation2]  }
   0x5   :  { %304 = vmatprep.subr.mxu0 %v361_v4  ;;  %v19_v19 = vld [vmem:[%s424_s1 + $0x22] sm:$0xff]  ;;  %v324_v20 = vpack.c.bf16 %v18_v18, %v17_v17  ;;  %v20_v21 = vld [vmem:[%s424_s1 + $0x2a] sm:$0xff]  ;;  %v21_v28 = vld [vmem:[%s424_s1 + $0x32] sm:$0x3]  ;;  %s274_s29 = sshll.u32 %s362_s28, 4  ;;  %vm266_vm4 = vcmask 254976   ;;  %s275_s29 = int_to_ptr.vmem [resolvable:$true] %s274_s29 }
   0x6   :  { %v327_v22 = vpack.c.bf16 %v20_v21, %v19_v19  ;;  %v285_v31 = vld [vmem:[%s424_s1 + $0x11] ss:$0 sm:$0xff]  ;;  %s335_s30 = scalar_lea.vmem %s275_s29, 32  ;;  %p340_p1 = scmp.lt.s32.totalorder %s275_s29, %s275_s29 }
   0x7   :  { %302 = vmatmul.mubr.msk.f32.vlgmr.msra.gmra.mrb[0].mxu0 %vm26_vm1, %v12_v5  ;;  %325 = vmatpush3.bf16.msra.mxu1 %v324_v20  ;;  %p336_p0 = scmp.ne.s32.totalorder %s275_s29, %s335_s30  ;;  %p341_p2 = scmp.lt.s32.totalorder %s335_s30, %s335_s30 }
   0x8   :  { %306 = vmatprep.mubr.msk.f32.mxu0 %vm360_vm0, %v361_v4  ;;  %326 = vmatprep.subr.bf16.mxu1 %v359_v2 }
   0x9   :  { %p342_p3 = por %p341_p2, %p340_p1 }
   0xb   :  { %328 = vmatpush3.bf16.msra.mxu1 %v327_v22  ;;  %p343_p4 = pnand %p342_p3, %p336_p0 }
  0xda   :  { %v96_v7 = vpop.f32.mrb[0].mxu0 }
  0xdb   :  { %v97_v8 = vadd.f32 %v282_v6, %v96_v7  ;;  %v303_v9 = vpop.f32.mrb[1].mxu0 }
  0xdd   :  { %v100_v10 = vmax.f32 %v97_v8, 0.0 }
  0xdf   :  { %v102_v11 = vsel %vm101_vm2, %v100_v10, 0.0 }
  0xe0   :  { %103 = vadd.xlane.f32.xlu0 %v102_v11 }
 0x16d   :  { %v104_v12 = vpop.xlane.xlu0 %103 }
 0x16e   :  { %v105_v13 = vmul.f32 0.03125, %v104_v12 }
 0x170   :  { %v106_v14 = vsub.f32 %v100_v10, %v105_v13 }
 0x172   :  { %v107_v15 = vmul.f32 %v106_v14, %v106_v14 }
 0x174   :  { %v108_v16 = vsel %vm101_vm2, %v107_v15, 0.0 }
 0x175   :  { %109 = vadd.xlane.f32.xlu0 %v108_v16 }
 0x202   :  { %v110_v23 = vpop.xlane.xlu0 %109 }
 0x203   :  { %v111_v24 = vmul.f32 0.03125, %v110_v23 }
 0x205   :  { %v112_v25 = vadd.f32 1e-05, %v111_v24 }
 0x207   :  { %333 = vrsqrt.f32 %v112_v25 }
 0x211   :  { %v334_v26 = vpop.eup %333 }
 0x212   :  { %v114_v27 = vmul.f32 %v334_v26, %v106_v14 }
 0x214   :  { %305 = vmatpush3.msra.mxu0 %v114_v27 }
 0x215   :  { %307 = vmatmul.mubr.msk.f32.vlgmr.msra.gmra.mrb[2].mxu0 %vm115_vm3, %v21_v28 }
 0x2e8   :  { %v185_v29 = vpop.f32.mrb[2].mxu0 }
 0x2e9   :  { %v308_v30 = vpop.f32.mrb[3].mxu0  ;;  %318 = vmatmul.mubr.msk.f32.vlgmr.msra.gmra.mrb[0].mxu1 %vm101_vm2, %v185_v29 }
 0x3bc   :  { %v262_v32 = vpop.f32.mrb[0].mxu1 }
 0x3bd   :  { %v263_v33 = vadd.f32 %v285_v31, %v262_v32  ;;  %v319_v34 = vpop.f32.mrb[1].mxu1 }
 0x3bf   :  { %267 = vst.msk [vmem:[#allocation2] sm:$0x3] %vm266_vm4, %v263_v33 }
 0x3c0   :  { %346 = shalt.err (!%p343_p4)
}
 0x3c1   :  { %s347_s5 = scalar_lea.hbm %s425_s2, 32 }
 0x3c2   :  { %p348_p5 = scmp.ne.s32.totalorder %s425_s2, %s347_s5  ;;  %p351_p6 = scmp.lt.u32.totalorder %s347_s5, %s425_s2 }
 0x3c4   :  { %p353_p7 = pnand %p351_p6, %p348_p5 }
 0x3c6   :  { %356 = shalt.err (!%p353_p7)
}
 0x3c7   :  { %277 = dma.vmem_to_hbm [thread:$0]  %s275_s29, 32, %s425_s2, [#allocation3]  }
 0x3c8   :  { %357 = dma.done.wait [#allocation3], 32  }
 0x3c9   :  { %358 = vsyncadd [#allocation3], 4294967264 }
 0x3ca   :  { %281 = vsyncpa [#allocation3], 1 }

</bundles_post_ra>
